<compile_context>
chip_gen: v6e
topology: v6e:2x2x1
jax: 0.10.0
libtpu: 0.0.40
codegen_flags: <defaults>
</compile_context>

<pallas_src>
import functools

import jax
import jax.numpy as jnp
from jax.experimental import pallas as pl
from jax.experimental.pallas import tpu as pltpu


def _ce_label_smooth_kernel(logits_ref, targets_ref, rows_ref, *,
                            epsilon, num_classes, batch, block_b):
    b = pl.program_id(0)

    x = logits_ref[...].astype(jnp.float32)          # (block_b, K) f32 math
    tb, k = x.shape

    # Per-row reductions taken directly on x (no materialized `shifted`):
    #   row_loss = logsumexp(x) - (1-eps) * x[r, t_r] - (eps/K) * sum_j x[r, j]
    m = jnp.max(x, axis=1, keepdims=True)                              # (tb,1)
    lse = m + jnp.log(jnp.sum(jnp.exp(x - m), axis=1, keepdims=True))  # (tb,1)
    sum_x = jnp.sum(x, axis=1, keepdims=True)                          # (tb,1)

    # Target logit via a lane-iota select (targets are resident; slice them).
    start = pl.multiple_of(b * block_b, 8)
    tgt = targets_ref[pl.ds(start, block_b), :]                        # (tb,1)
    class_iota = jax.lax.broadcasted_iota(jnp.int32, (tb, k), 1)
    x_t = jnp.sum(jnp.where(class_iota == tgt, x, 0.0),
                  axis=1, keepdims=True)                               # (tb,1)

    row_loss = lse - (1.0 - epsilon) * x_t - (epsilon / num_classes) * sum_x

    # Rows past the true batch (OOB garbage in the last partial block) are
    # zeroed with a select, so NaN/Inf garbage cannot leak into the sum.
    row_ids = start + jax.lax.broadcasted_iota(jnp.int32, (tb, 1), 0)
    rows_ref[...] = jnp.where(row_ids < batch, row_loss, 0.0)


def _round_up(x, m):
    return (x + m - 1) // m * m


def _vmem_budgets():
    """(tiling budget, vmem_limit_bytes) based on this chip's VMEM capacity."""
    cap = 64 * 1024 * 1024
    try:
        info = pltpu.get_tpu_info()
        cap = int(getattr(info, "vmem_capacity_bytes", cap))
    except Exception:
        pass
    if cap >= 100 * 1024 * 1024:                      # v5e / v6e: 128 MiB VMEM
        return 80 * 1024 * 1024, 112 * 1024 * 1024
    return 28 * 1024 * 1024, 48 * 1024 * 1024          # v7x: 64 MiB VMEM


def cross_entropy_label_smooth(logits, targets, num_classes, epsilon=0.1,
                               block_b=None):
    """Pallas TPU implementation of CrossEntropyLabelSmooth.forward.

    Args:
      logits:  (B, num_classes) float array (pre-softmax), any float dtype
               (bf16 stays bf16 in HBM; upcast happens inside the kernel).
      targets: (B,) int array of ground-truth class indices.
    Returns:
      scalar float32 loss.
    """
    B, K = logits.shape
    assert K == num_classes

    itemsize = jnp.dtype(logits.dtype).itemsize
    # Minimum sublane tile: 8 for f32, 16 for bf16, 32 for 8-bit types.
    min_b = 8 * max(1, 4 // itemsize)

    budget, vmem_limit = _vmem_budgets()
    # Double-buffered logits tile + ~4 f32-wide per-row temporaries.
    per_row = 2 * K * itemsize + 4 * K * 4 + 16
    if block_b is None:
        fit = max(min_b, (budget // per_row) // min_b * min_b)
        block_b = min(2048, fit)
    block_b = max(min_b, _round_up(int(block_b), min_b))
    block_b = min(block_b, _round_up(B, min_b))

    nb = (B + block_b - 1) // block_b
    B_pad = nb * block_b

    # Targets are tiny: pad them to the grid extent and keep them VMEM-resident
    # (constant index_map => DMA'd once).  Logits are NOT padded — the final
    # partial block reads garbage rows which the kernel masks out.
    t = targets.astype(jnp.int32)
    if B_pad != B:
        t = jnp.pad(t, ((0, B_pad - B),))
    targets_2d = t.reshape(B_pad, 1)

    kernel = functools.partial(
        _ce_label_smooth_kernel,
        epsilon=float(epsilon), num_classes=int(num_classes),
        batch=int(B), block_b=int(block_b))

    cost = pl.CostEstimate(
        flops=8 * B * K,
        transcendentals=B * K + B,
        bytes_accessed=B * K * itemsize + B_pad * 4 + B_pad * 4)

    row_losses = pl.pallas_call(
        kernel,
        out_shape=jax.ShapeDtypeStruct((B_pad, 1), jnp.float32),
        grid_spec=pltpu.PrefetchScalarGridSpec(
            num_scalar_prefetch=0,
            grid=(nb,),
            in_specs=[
                pl.BlockSpec((block_b, K), lambda b: (b, 0)),
                pl.BlockSpec((B_pad, 1), lambda b: (0, 0)),   # resident targets
            ],
            out_specs=pl.BlockSpec((block_b, 1), lambda b: (b, 0)),
        ),
        compiler_params=pltpu.CompilerParams(
            dimension_semantics=("parallel",),   # megacore-splittable on v7x
            vmem_limit_bytes=vmem_limit,
        ),
        cost_estimate=cost,
    )(logits, targets_2d)

    # Tiny finalization outside the kernel (f32, parallel-safe, B_pad floats).
    return jnp.sum(row_losses) * (1.0 / B)


def _reference(logits, targets, num_classes, epsilon=0.1):
    # Pure-JAX reference mirroring the PyTorch module.
    log_probs = jax.nn.log_softmax(logits.astype(jnp.float32), axis=1)
    onehot = jax.nn.one_hot(targets, num_classes, dtype=jnp.float32)
    smoothed = (1.0 - epsilon) * onehot + epsilon / num_classes
    return jnp.sum(jnp.mean(-smoothed * log_probs, axis=0))


if __name__ == "__main__":
    key = jax.random.PRNGKey(0)
    k1, k2, k3, k4 = jax.random.split(key, 4)
    eps = 0.1

    # Case 1: single-block path, float32 logits, auto block_b.
    B1, K1 = 8, 16
    logits1 = jax.random.normal(k1, (B1, K1), dtype=jnp.float32)
    targets1 = jax.random.randint(k2, (B1,), 0, K1, dtype=jnp.int32)
    loss1 = jax.block_until_ready(
        cross_entropy_label_smooth(logits1, targets1, K1, eps))
    ref1 = _reference(logits1, targets1, K1, eps)
    assert jnp.allclose(loss1, ref1, atol=1e-5, rtol=1e-5), (loss1, ref1)

    # Case 2: multi-block grid with an unpadded, partially-OOB final block
    # (B=20 with block_b=8 -> 3 blocks, last block masked), float32 logits.
    B2, K2 = 20, 48
    logits2 = jax.random.normal(k3, (B2, K2), dtype=jnp.float32)
    targets2 = jax.random.randint(k4, (B2,), 0, K2, dtype=jnp.int32)
    loss2 = jax.block_until_ready(
        cross_entropy_label_smooth(logits2, targets2, K2, eps, block_b=8))
    ref2 = _reference(logits2, targets2, K2, eps)
    assert jnp.allclose(loss2, ref2, atol=1e-5, rtol=1e-5), (loss2, ref2)

    # Case 3: bf16 logits kept bf16 in HBM (upcast inside the kernel),
    # block_b clamped to the bf16 sublane minimum (16) -> 2 blocks.
    logits3 = logits2.astype(jnp.bfloat16)
    loss3 = jax.block_until_ready(
        cross_entropy_label_smooth(logits3, targets2, K2, eps, block_b=8))
    ref3 = _reference(logits3, targets2, K2, eps)
    assert jnp.allclose(loss3, ref3, atol=1e-4, rtol=1e-4), (loss3, ref3)

    print("KERNEL_OK")
</pallas_src>

<mosaic_0001>
module attributes {stable_mosaic.version = 11 : i64} {
  func.func @_ce_label_smooth_kernel(%arg0: i32, %arg1: memref<8x16xf32, #tpu.memory_space<vmem>>, %arg2: memref<8x1xi32, #tpu.memory_space<vmem>>, %arg3: memref<8x1xf32, #tpu.memory_space<vmem>>) attributes {dimension_semantics = [#tpu.dimension_semantics<parallel>], iteration_bounds = array<i64: 1>, scalar_prefetch = 0 : i64, scratch_operands = 0 : i64, tpu.core_type = #tpu.core_type<tc>, window_params = [{transform_indices = @transform_0, window_bounds = array<i64: 8, 16>}, {pipeline_mode = #tpu.pipeline_mode<synchronous>, transform_indices = @transform_1, window_bounds = array<i64: 8, 1>}, {transform_indices = @transform_2, window_bounds = array<i64: 8, 1>}]} {
    %c0 = arith.constant 0 : index
    %c0_0 = arith.constant 0 : index
    %0 = vector.load %arg1[%c0, %c0_0] : memref<8x16xf32, #tpu.memory_space<vmem>>, vector<8x16xf32>
    %cst = arith.constant dense<0xFF800000> : vector<8xf32>
    %1 = vector.multi_reduction <maximumf>, %0, %cst [1] : vector<8x16xf32> to vector<8xf32>
    %2 = vector.shape_cast %1 : vector<8xf32> to vector<8x1xf32>
    %3 = vector.broadcast %2 : vector<8x1xf32> to vector<8x16xf32>
    %4 = arith.subf %0, %3 : vector<8x16xf32>
    %5 = math.exp %4 : vector<8x16xf32>
    %cst_1 = arith.constant dense<0.000000e+00> : vector<8xf32>
    %6 = vector.multi_reduction <add>, %5, %cst_1 [1] : vector<8x16xf32> to vector<8xf32>
    %7 = vector.shape_cast %6 : vector<8xf32> to vector<8x1xf32>
    %8 = math.log %7 : vector<8x1xf32>
    %9 = arith.addf %2, %8 : vector<8x1xf32>
    %cst_2 = arith.constant dense<0.000000e+00> : vector<8xf32>
    %10 = vector.multi_reduction <add>, %0, %cst_2 [1] : vector<8x16xf32> to vector<8xf32>
    %11 = vector.shape_cast %10 : vector<8xf32> to vector<8x1xf32>
    %c8_i32 = arith.constant 8 : i32
    %12 = arith.muli %arg0, %c8_i32 : i32
    %13 = tpu.assume_multiple %12, 8 : i32
    %14 = arith.index_cast %13 : i32 to index
    %c0_3 = arith.constant 0 : index
    %15 = vector.load %arg2[%14, %c0_3] : memref<8x1xi32, #tpu.memory_space<vmem>>, vector<8x1xi32>
    %16 = tpu.iota {dimensions = array<i32: 1>} : vector<8x16xi32>
    %17 = vector.broadcast %15 : vector<8x1xi32> to vector<8x16xi32>
    %18 = arith.cmpi eq, %16, %17 : vector<8x16xi32>
    %cst_4 = arith.constant 0.000000e+00 : f32
    %19 = vector.broadcast %cst_4 : f32 to vector<8x16xf32>
    %20 = arith.select %18, %0, %19 : vector<8x16xi1>, vector<8x16xf32>
    %cst_5 = arith.constant dense<0.000000e+00> : vector<8xf32>
    %21 = vector.multi_reduction <add>, %20, %cst_5 [1] : vector<8x16xf32> to vector<8xf32>
    %22 = vector.shape_cast %21 : vector<8xf32> to vector<8x1xf32>
    %cst_6 = arith.constant 0.899999976 : f32
    %23 = vector.broadcast %cst_6 : f32 to vector<8x1xf32>
    %24 = arith.mulf %23, %22 : vector<8x1xf32>
    %25 = arith.subf %9, %24 : vector<8x1xf32>
    %cst_7 = arith.constant 6.250000e-03 : f32
    %26 = vector.broadcast %cst_7 : f32 to vector<8x1xf32>
    %27 = arith.mulf %26, %11 : vector<8x1xf32>
    %28 = arith.subf %25, %27 : vector<8x1xf32>
    %29 = tpu.iota {dimensions = array<i32: 0>} : vector<8x1xi32>
    %30 = vector.broadcast %13 : i32 to vector<8x1xi32>
    %31 = arith.addi %30, %29 : vector<8x1xi32>
    %c8_i32_8 = arith.constant 8 : i32
    %32 = vector.broadcast %c8_i32_8 : i32 to vector<8x1xi32>
    %33 = arith.cmpi slt, %31, %32 : vector<8x1xi32>
    %cst_9 = arith.constant 0.000000e+00 : f32
    %34 = vector.broadcast %cst_9 : f32 to vector<8x1xf32>
    %35 = arith.select %33, %28, %34 : vector<8x1xi1>, vector<8x1xf32>
    %c0_10 = arith.constant 0 : index
    %c0_11 = arith.constant 0 : index
    %36 = vector.load %arg3[%c0_10, %c0_11] : memref<8x1xf32, #tpu.memory_space<vmem>>, vector<8x1xf32>
    tpu.vector_store %arg3[%c0_10, %c0_11], %35 {strides = array<i32>} : memref<8x1xf32, #tpu.memory_space<vmem>>, vector<8x1xf32>,
    return
  }
  func.func @transform_0(%arg0: i32) -> (i32, i32) {
    %c0_i32 = arith.constant 0 : i32
    %c0_i32_0 = arith.constant 0 : i32
    return %arg0, %c0_i32 : i32, i32
  }
  func.func @transform_1(%arg0: i32) -> (i32, i32) {
    %c0_i32 = arith.constant 0 : i32
    %c0_i32_0 = arith.constant 0 : i32
    %c0_i32_1 = arith.constant 0 : i32
    return %c0_i32, %c0_i32_0 : i32, i32
  }
  func.func @transform_2(%arg0: i32) -> (i32, i32) {
    %c0_i32 = arith.constant 0 : i32
    %c0_i32_0 = arith.constant 0 : i32
    return %arg0, %c0_i32 : i32, i32
  }
}

</mosaic_0001>

<bundles_post_ra>
// kernel: tpu_custom_call.1
= control target key start
LH: loop header
LB: loop body
LE: loop exit
PB: predicated region body
PF: predicated region fallthrough
CT: control target
= control target key end

     0   :  { %vm12_vm0 = vcmask 130048   ;;  %v63_v1 = vmov 0   ;;  %v31_v7 = vlaneseq  ;;  %vm51_vm2 = vcmask 7168   ;;  %s92_s0 = inlined_call_operand.vmem [shape: f32[8,16], index: 0, kind: input, shape index: {}]   ;;  %s93_s1 = inlined_call_operand.vmem [shape: s32[8,1], index: 1, kind: input, shape index: {}]   ;;  %s94_s2 = inlined_call_operand.vmem [shape: f32[8,1], index: 2, kind: output, shape index: {}]  }
   0x1   :  { %v11_v0 = vld [vmem:[%s92_s0] sm:$0xff]  ;;  %58 = vset.pattern.permute.xlu0 %v63_v1 }
   0x2   :  { %v13_v2 = vsel %vm12_vm0, %v11_v0, -inf  ;;  %v30_v3 = vld [vmem:[%s93_s1] sm:$0xff]  ;;  %v32_v8 = vand.u32 127, %v31_v7  ;;  %v25_v14 = vsel %vm12_vm0, %v11_v0, 0.0 }
   0x3   :  { %14 = vmax.xlane.f32.xlu0 %v13_v2 }
  0x19   :  { %34 = vperm.xlu0 %58, %v30_v3  }
  0x8c   :  { %v15_v4 = vpop.xlane.xlu0 %14 }
  0x8d   :  { %v16_v5 = vsub.f32 %v11_v0, %v15_v4 }
  0x8f   :  { %v17_v6 = vmul.f32 1.442695, %v16_v5 }
  0x91   :  { %59 = vpow2.f32 %v17_v6 }
  0x94   :  { %v35_v9 = vpop.permute.xlu0 %34 }
  0x95   :  { %vm36_vm1 = vcmp.eq.s32.totalorder %v32_v8, %v35_v9 }
  0x96   :  { %v37_v11 = vsel %vm36_vm1, %v11_v0, 0.0 }
  0x97   :  { %v38_v13 = vsel %vm12_vm0, %v37_v11, 0.0 }
  0x9e   :  { %v60_v10 = vpop.eup %59 }
  0x9f   :  { %v19_v12 = vsel %vm12_vm0, %v60_v10, 0.0 }
  0xa0   :  { %20 = vadd.xlane.f32.xlu1 %v19_v12 }
  0xa4   :  { %39 = vadd.xlane.f32.xlu1 %v38_v13 }
  0xa8   :  { %26 = vadd.xlane.f32.xlu1 %v25_v14 }
 0x129   :  { %v21_v15 = vpop.xlane.xlu1 %20 }
 0x12a   :  { %61 = vlog2.f32 %v21_v15 }
 0x12d   :  { %v40_v16 = vpop.xlane.xlu1 %39 }
 0x12e   :  { %v41_v21 = vmul.f32 0.9, %v40_v16 }
 0x131   :  { %v27_v18 = vpop.xlane.xlu1 %26 }
 0x132   :  { %v43_v22 = vmul.f32 0.00625, %v27_v18 }
 0x137   :  { %v62_v17 = vpop.eup %61 }
 0x138   :  { %v23_v19 = vmul.f32 0.6931472, %v62_v17 }
 0x13a   :  { %v24_v20 = vadd.f32 %v23_v19, %v15_v4 }
 0x13c   :  { %v42_v23 = vsub.f32 %v24_v20, %v41_v21 }
 0x13e   :  { %v44_v24 = vsub.f32 %v42_v23, %v43_v22 }
 0x140   :  { %52 = vst.msk [vmem:[%s94_s2] sm:$0xff] %vm51_vm2, %v44_v24 }

</bundles_post_ra>
